<compile_context>
chip_gen: v5e
topology: v5e:2x2
jax: 0.10.0
libtpu: 0.0.40
codegen_flags: <defaults>
</compile_context>

<pallas_src>
import jax
import jax.numpy as jnp
from jax.experimental import pallas as pl
from jax.experimental.pallas import tpu as pltpu

BN_EPS = 1e-5
DIMS = (5, 64, 32, 16, 4)   # feature dims of the 4 Linear layers


def mlp_kernel(x_ref,
               w1_ref, b1_ref,
               w2_ref, b2_ref,
               w3_ref, b3_ref,
               w4_ref, b4_ref,
               o_ref):
    """Fused eval-mode forward for one batch tile, feature-major layout.

    Activations are (features, batch_tile): batch on the lane axis, features
    on sublanes.  BatchNorm (running stats) + Linear bias are pre-folded into
    (W'^T, b') on the host, so each hidden layer is one bf16 matmul (f32
    accumulate) + bias + ReLU.  Dropout is identity in eval mode.
    """
    h = x_ref[...].astype(jnp.bfloat16)                       # (5, T), cast in-kernel

    # Layer 1: Linear(5,64) [+ folded BN(64)] + ReLU           -> (64, T)
    h = jnp.dot(w1_ref[...], h, preferred_element_type=jnp.float32) + b1_ref[...]
    h = jnp.maximum(h, 0.0)

    # Layer 2: Linear(64,32) [+ folded BN(32)] + ReLU          -> (32, T)
    h = jnp.dot(w2_ref[...], h.astype(jnp.bfloat16),
                preferred_element_type=jnp.float32) + b2_ref[...]
    h = jnp.maximum(h, 0.0)

    # Layer 3: Linear(32,16) [+ folded BN(16)] + ReLU          -> (16, T)
    h = jnp.dot(w3_ref[...], h.astype(jnp.bfloat16),
                preferred_element_type=jnp.float32) + b3_ref[...]
    h = jnp.maximum(h, 0.0)

    # Layer 4: Linear(16,4) + Softmax over the feature axis    -> (4, T)
    logits = jnp.dot(w4_ref[...], h.astype(jnp.bfloat16),
                     preferred_element_type=jnp.float32) + b4_ref[...]
    m = jnp.max(logits, axis=0, keepdims=True)                # (1, T) sublane reduce
    e = jnp.exp(logits - m)
    denom = jnp.sum(e, axis=0, keepdims=True)                 # (1, T)
    # Exact divide (not approx reciprocal): rows sum to 1 to f32 precision.
    o_ref[...] = e * (1.0 / denom)

    # TODO(synk): training-mode Dropout / batch-statistics BatchNorm not
    # implemented (eval-mode forward semantics reproduced instead).


def _round_up(n, m):
    return ((n + m - 1) // m) * m


def _resident_spec(shape):
    """Full-array block, pinned VMEM-resident across all grid steps."""
    return pl.BlockSpec(shape, lambda i: (0,) * len(shape))


def _pick_tile_n(n):
    """Largest multiple-of-128 batch tile (cap 2048) that still yields >= 2
    grid steps when N allows it, so the 'parallel' axis can use both v7x TCs."""
    n_pad = _round_up(max(n, 1), 128)
    if n_pad <= 128:
        return 128
    return min(2048, _round_up(pl.cdiv(n_pad, 2), 128))


def custom_model_forward(x, folded_params, tile_n=None):
    """x: (N, 5) float32 -> (N, 4) float32 softmax probabilities."""
    N = x.shape[0]
    (w1, b1, w2, b2, w3, b3, w4, b4) = folded_params

    if tile_n is None:
        tile_n = _pick_tile_n(N)
    assert tile_n % 128 == 0, "batch tile must be a multiple of 128 lanes"

    n_pad = _round_up(max(N, 1), tile_n)

    # Feature-major (transposed) layout: batch on the 128-wide lane axis.
    x_t = jnp.transpose(x)                                    # (5, N) f32
    if n_pad != N:
        x_t = jnp.pad(x_t, ((0, 0), (0, n_pad - N)))

    grid = (n_pad // tile_n,)

    in_specs = [
        pl.BlockSpec((DIMS[0], tile_n), lambda i: (0, i)),    # batch-tiled x
        _resident_spec(w1.shape), _resident_spec(b1.shape),
        _resident_spec(w2.shape), _resident_spec(b2.shape),
        _resident_spec(w3.shape), _resident_spec(b3.shape),
        _resident_spec(w4.shape), _resident_spec(b4.shape),
    ]
    out_spec = pl.BlockSpec((DIMS[-1], tile_n), lambda i: (0, i))

    out = pl.pallas_call(
        mlp_kernel,
        out_shape=jax.ShapeDtypeStruct((DIMS[-1], n_pad), jnp.float32),
        grid=grid,
        in_specs=in_specs,
        out_specs=out_spec,
        compiler_params=pltpu.CompilerParams(
            dimension_semantics=("parallel",)),
    )(x_t, w1, b1, w2, b2, w3, b3, w4, b4)

    return jnp.transpose(out[:, :N])                          # back to (N, 4)


def init_params(key):
    """Raw PyTorch-style parameters (non-trivial BN stats to exercise the fold)."""
    keys = jax.random.split(key, 20)
    ki = 0
    layers = []
    for li, (din, dout) in enumerate(zip(DIMS[:-1], DIMS[1:])):
        bound = 1.0 / jnp.sqrt(jnp.float32(din))
        w = jax.random.uniform(keys[ki], (din, dout), jnp.float32, -bound, bound); ki += 1
        b = jax.random.uniform(keys[ki], (1, dout), jnp.float32, -bound, bound);   ki += 1
        if li < 3:   # BatchNorm1d after the first three Linears
            gamma = jax.random.uniform(keys[ki], (1, dout), jnp.float32, 0.5, 1.5); ki += 1
            beta = 0.1 * jax.random.normal(keys[ki], (1, dout), jnp.float32);       ki += 1
            mean = 0.1 * jax.random.normal(keys[ki], (1, dout), jnp.float32);       ki += 1
            var = jax.random.uniform(keys[ki], (1, dout), jnp.float32, 0.5, 1.5);   ki += 1
            layers.append((w, b, gamma, beta, mean, var))
        else:
            layers.append((w, b))
    return tuple(layers)


def fold_params(raw):
    """Fold eval-mode BatchNorm + Linear bias into per-layer (W'^T, b').

    scale = gamma / sqrt(var + eps);  W'^T = (W * scale)^T (dout, din) bf16;
    b' = ((b - mean) * scale + beta)^T (dout, 1) f32 — feature-major layout.
    """
    folded = []
    for (w, b, gamma, beta, mean, var) in raw[:3]:
        scale = gamma / jnp.sqrt(var + BN_EPS)                     # (1, dout)
        folded.append(jnp.transpose(w * scale).astype(jnp.bfloat16))   # (dout, din)
        folded.append(jnp.transpose((b - mean) * scale + beta))        # (dout, 1)
    w4, b4 = raw[3]
    folded.append(jnp.transpose(w4).astype(jnp.bfloat16))
    folded.append(jnp.transpose(b4))
    return tuple(folded)


def reference_forward_raw(x, raw):
    """Full-f32 eval-mode reference using the raw (unfolded) parameters."""
    h = x
    for (w, b, gamma, beta, mean, var) in raw[:3]:
        h = h @ w + b
        h = (h - mean) / jnp.sqrt(var + BN_EPS) * gamma + beta
        h = jnp.maximum(h, 0.0)
    w4, b4 = raw[3]
    return jax.nn.softmax(h @ w4 + b4, axis=1)


def reference_forward_folded(x, folded):
    """Pure-JAX reference using the identical folded bf16 weights / bf16 activations."""
    (w1, b1, w2, b2, w3, b3, w4, b4) = folded
    h = jnp.transpose(x).astype(jnp.bfloat16)                     # (5, N)
    for w, b in ((w1, b1), (w2, b2), (w3, b3)):
        h = jnp.dot(w, h, preferred_element_type=jnp.float32) + b
        h = jnp.maximum(h, 0.0).astype(jnp.bfloat16)
    logits = jnp.dot(w4, h, preferred_element_type=jnp.float32) + b4
    return jnp.transpose(jax.nn.softmax(logits, axis=0))          # (N, 4)


if __name__ == "__main__":
    key = jax.random.PRNGKey(0)
    k_x, k_p = jax.random.split(key)

    raw = init_params(k_p)
    folded = fold_params(raw)

    # --- small single-tile run ---
    N = 16
    x = jax.random.normal(k_x, (N, DIMS[0]), dtype=jnp.float32)
    out = jax.block_until_ready(custom_model_forward(x, folded))
    assert out.shape == (N, DIMS[-1])
    # Exact softmax normalization now that the divide is exact.
    assert jnp.allclose(jnp.sum(out, axis=1), 1.0, atol=1e-4)
    assert jnp.allclose(out, reference_forward_folded(x, folded), atol=5e-3), \
        "mismatch vs folded bf16 reference"
    assert jnp.allclose(out, reference_forward_raw(x, raw), atol=3e-2), \
        "mismatch vs f32 raw reference"

    # --- multi-tile run (3 grid steps over the batch) to exercise tiling ---
    N2 = 260
    x2 = jax.random.normal(k_x, (N2, DIMS[0]), dtype=jnp.float32)
    out2 = jax.block_until_ready(custom_model_forward(x2, folded, tile_n=128))
    assert out2.shape == (N2, DIMS[-1])
    assert jnp.allclose(jnp.sum(out2, axis=1), 1.0, atol=1e-4)
    assert jnp.allclose(out2, reference_forward_folded(x2, folded), atol=5e-3), \
        "mismatch vs folded bf16 reference (multi-tile)"
    assert jnp.allclose(out2, reference_forward_raw(x2, raw), atol=3e-2), \
        "mismatch vs f32 raw reference (multi-tile)"

    print("KERNEL_OK")
</pallas_src>

<mosaic_0001>
module attributes {stable_mosaic.version = 11 : i64} {
  func.func @mlp_kernel(%arg0: i32, %arg1: memref<5x128xf32, #tpu.memory_space<vmem>>, %arg2: memref<64x5xbf16, #tpu.memory_space<vmem>>, %arg3: memref<64x1xf32, #tpu.memory_space<vmem>>, %arg4: memref<32x64xbf16, #tpu.memory_space<vmem>>, %arg5: memref<32x1xf32, #tpu.memory_space<vmem>>, %arg6: memref<16x32xbf16, #tpu.memory_space<vmem>>, %arg7: memref<16x1xf32, #tpu.memory_space<vmem>>, %arg8: memref<4x16xbf16, #tpu.memory_space<vmem>>, %arg9: memref<4x1xf32, #tpu.memory_space<vmem>>, %arg10: memref<4x128xf32, #tpu.memory_space<vmem>>) attributes {dimension_semantics = [#tpu.dimension_semantics<parallel>], iteration_bounds = array<i64: 1>, scalar_prefetch = 0 : i64, scratch_operands = 0 : i64, tpu.core_type = #tpu.core_type<tc>, window_params = [{transform_indices = @transform_0, window_bounds = array<i64: 5, 128>}, {pipeline_mode = #tpu.pipeline_mode<synchronous>, transform_indices = @transform_1, window_bounds = array<i64: 64, 5>}, {pipeline_mode = #tpu.pipeline_mode<synchronous>, transform_indices = @transform_2, window_bounds = array<i64: 64, 1>}, {pipeline_mode = #tpu.pipeline_mode<synchronous>, transform_indices = @transform_3, window_bounds = array<i64: 32, 64>}, {pipeline_mode = #tpu.pipeline_mode<synchronous>, transform_indices = @transform_4, window_bounds = array<i64: 32, 1>}, {pipeline_mode = #tpu.pipeline_mode<synchronous>, transform_indices = @transform_5, window_bounds = array<i64: 16, 32>}, {pipeline_mode = #tpu.pipeline_mode<synchronous>, transform_indices = @transform_6, window_bounds = array<i64: 16, 1>}, {pipeline_mode = #tpu.pipeline_mode<synchronous>, transform_indices = @transform_7, window_bounds = array<i64: 4, 16>}, {pipeline_mode = #tpu.pipeline_mode<synchronous>, transform_indices = @transform_8, window_bounds = array<i64: 4, 1>}, {transform_indices = @transform_9, window_bounds = array<i64: 4, 128>}]} {
    %c0 = arith.constant 0 : index
    %c0_0 = arith.constant 0 : index
    %0 = vector.load %arg1[%c0, %c0_0] : memref<5x128xf32, #tpu.memory_space<vmem>>, vector<5x128xf32>
    %1 = arith.truncf %0 : vector<5x128xf32> to vector<5x128xbf16>
    %c0_1 = arith.constant 0 : index
    %c0_2 = arith.constant 0 : index
    %2 = vector.load %arg2[%c0_1, %c0_2] : memref<64x5xbf16, #tpu.memory_space<vmem>>, vector<64x5xbf16>
    %cst = arith.constant dense<0.000000e+00> : vector<64x128xf32>
    %3 = tpu.matmul %2, %1, %cst {dimension_numbers = #tpu.dot_dimension_numbers<[1], [0], [0], [1], [0, 0, 1, 1], [], []>} : vector<64x5xbf16>, vector<5x128xbf16>, vector<64x128xf32> -> vector<64x128xf32>
    %c0_3 = arith.constant 0 : index
    %c0_4 = arith.constant 0 : index
    %4 = vector.load %arg3[%c0_3, %c0_4] : memref<64x1xf32, #tpu.memory_space<vmem>>, vector<64x1xf32>
    %5 = vector.broadcast %4 : vector<64x1xf32> to vector<64x128xf32>
    %6 = arith.addf %3, %5 : vector<64x128xf32>
    %cst_5 = arith.constant 0.000000e+00 : f32
    %7 = vector.broadcast %cst_5 : f32 to vector<64x128xf32>
    %8 = arith.maximumf %6, %7 : vector<64x128xf32>
    %c0_6 = arith.constant 0 : index
    %c0_7 = arith.constant 0 : index
    %9 = vector.load %arg4[%c0_6, %c0_7] : memref<32x64xbf16, #tpu.memory_space<vmem>>, vector<32x64xbf16>
    %10 = arith.truncf %8 : vector<64x128xf32> to vector<64x128xbf16>
    %cst_8 = arith.constant dense<0.000000e+00> : vector<32x128xf32>
    %11 = tpu.matmul %9, %10, %cst_8 {dimension_numbers = #tpu.dot_dimension_numbers<[1], [0], [0], [1], [0, 0, 1, 1], [], []>} : vector<32x64xbf16>, vector<64x128xbf16>, vector<32x128xf32> -> vector<32x128xf32>
    %c0_9 = arith.constant 0 : index
    %c0_10 = arith.constant 0 : index
    %12 = vector.load %arg5[%c0_9, %c0_10] : memref<32x1xf32, #tpu.memory_space<vmem>>, vector<32x1xf32>
    %13 = vector.broadcast %12 : vector<32x1xf32> to vector<32x128xf32>
    %14 = arith.addf %11, %13 : vector<32x128xf32>
    %cst_11 = arith.constant 0.000000e+00 : f32
    %15 = vector.broadcast %cst_11 : f32 to vector<32x128xf32>
    %16 = arith.maximumf %14, %15 : vector<32x128xf32>
    %c0_12 = arith.constant 0 : index
    %c0_13 = arith.constant 0 : index
    %17 = vector.load %arg6[%c0_12, %c0_13] : memref<16x32xbf16, #tpu.memory_space<vmem>>, vector<16x32xbf16>
    %18 = arith.truncf %16 : vector<32x128xf32> to vector<32x128xbf16>
    %cst_14 = arith.constant dense<0.000000e+00> : vector<16x128xf32>
    %19 = tpu.matmul %17, %18, %cst_14 {dimension_numbers = #tpu.dot_dimension_numbers<[1], [0], [0], [1], [0, 0, 1, 1], [], []>} : vector<16x32xbf16>, vector<32x128xbf16>, vector<16x128xf32> -> vector<16x128xf32>
    %c0_15 = arith.constant 0 : index
    %c0_16 = arith.constant 0 : index
    %20 = vector.load %arg7[%c0_15, %c0_16] : memref<16x1xf32, #tpu.memory_space<vmem>>, vector<16x1xf32>
    %21 = vector.broadcast %20 : vector<16x1xf32> to vector<16x128xf32>
    %22 = arith.addf %19, %21 : vector<16x128xf32>
    %cst_17 = arith.constant 0.000000e+00 : f32
    %23 = vector.broadcast %cst_17 : f32 to vector<16x128xf32>
    %24 = arith.maximumf %22, %23 : vector<16x128xf32>
    %c0_18 = arith.constant 0 : index
    %c0_19 = arith.constant 0 : index
    %25 = vector.load %arg8[%c0_18, %c0_19] : memref<4x16xbf16, #tpu.memory_space<vmem>>, vector<4x16xbf16>
    %26 = arith.truncf %24 : vector<16x128xf32> to vector<16x128xbf16>
    %cst_20 = arith.constant dense<0.000000e+00> : vector<4x128xf32>
    %27 = tpu.matmul %25, %26, %cst_20 {dimension_numbers = #tpu.dot_dimension_numbers<[1], [0], [0], [1], [0, 0, 1, 1], [], []>} : vector<4x16xbf16>, vector<16x128xbf16>, vector<4x128xf32> -> vector<4x128xf32>
    %c0_21 = arith.constant 0 : index
    %c0_22 = arith.constant 0 : index
    %28 = vector.load %arg9[%c0_21, %c0_22] : memref<4x1xf32, #tpu.memory_space<vmem>>, vector<4x1xf32>
    %29 = vector.broadcast %28 : vector<4x1xf32> to vector<4x128xf32>
    %30 = arith.addf %27, %29 : vector<4x128xf32>
    %cst_23 = arith.constant dense<0xFF800000> : vector<128xf32>
    %31 = vector.multi_reduction <maximumf>, %30, %cst_23 [0] : vector<4x128xf32> to vector<128xf32>
    %32 = vector.shape_cast %31 : vector<128xf32> to vector<1x128xf32>
    %33 = vector.broadcast %32 : vector<1x128xf32> to vector<4x128xf32>
    %34 = arith.subf %30, %33 : vector<4x128xf32>
    %35 = math.exp %34 : vector<4x128xf32>
    %cst_24 = arith.constant dense<0.000000e+00> : vector<128xf32>
    %36 = vector.multi_reduction <add>, %35, %cst_24 [0] : vector<4x128xf32> to vector<128xf32>
    %37 = vector.shape_cast %36 : vector<128xf32> to vector<1x128xf32>
    %cst_25 = arith.constant 1.000000e+00 : f32
    %38 = vector.broadcast %cst_25 : f32 to vector<1x128xf32>
    %39 = arith.divf %38, %37 : vector<1x128xf32>
    %40 = vector.broadcast %39 : vector<1x128xf32> to vector<4x128xf32>
    %41 = arith.mulf %35, %40 : vector<4x128xf32>
    %c0_26 = arith.constant 0 : index
    %c0_27 = arith.constant 0 : index
    %42 = vector.load %arg10[%c0_26, %c0_27] : memref<4x128xf32, #tpu.memory_space<vmem>>, vector<4x128xf32>
    tpu.vector_store %arg10[%c0_26, %c0_27], %41 {strides = array<i32>} : memref<4x128xf32, #tpu.memory_space<vmem>>, vector<4x128xf32>,
    return
  }
  func.func @transform_0(%arg0: i32) -> (i32, i32) {
    %c0_i32 = arith.constant 0 : i32
    %c0_i32_0 = arith.constant 0 : i32
    return %c0_i32, %arg0 : i32, i32
  }
  func.func @transform_1(%arg0: i32) -> (i32, i32) {
    %c0_i32 = arith.constant 0 : i32
    %c0_i32_0 = arith.constant 0 : i32
    %c0_i32_1 = arith.constant 0 : i32
    return %c0_i32, %c0_i32_0 : i32, i32
  }
  func.func @transform_2(%arg0: i32) -> (i32, i32) {
    %c0_i32 = arith.constant 0 : i32
    %c0_i32_0 = arith.constant 0 : i32
    %c0_i32_1 = arith.constant 0 : i32
    return %c0_i32, %c0_i32_0 : i32, i32
  }
  func.func @transform_3(%arg0: i32) -> (i32, i32) {
    %c0_i32 = arith.constant 0 : i32
    %c0_i32_0 = arith.constant 0 : i32
    %c0_i32_1 = arith.constant 0 : i32
    return %c0_i32, %c0_i32_0 : i32, i32
  }
  func.func @transform_4(%arg0: i32) -> (i32, i32) {
    %c0_i32 = arith.constant 0 : i32
    %c0_i32_0 = arith.constant 0 : i32
    %c0_i32_1 = arith.constant 0 : i32
    return %c0_i32, %c0_i32_0 : i32, i32
  }
  func.func @transform_5(%arg0: i32) -> (i32, i32) {
    %c0_i32 = arith.constant 0 : i32
    %c0_i32_0 = arith.constant 0 : i32
    %c0_i32_1 = arith.constant 0 : i32
    return %c0_i32, %c0_i32_0 : i32, i32
  }
  func.func @transform_6(%arg0: i32) -> (i32, i32) {
    %c0_i32 = arith.constant 0 : i32
    %c0_i32_0 = arith.constant 0 : i32
    %c0_i32_1 = arith.constant 0 : i32
    return %c0_i32, %c0_i32_0 : i32, i32
  }
  func.func @transform_7(%arg0: i32) -> (i32, i32) {
    %c0_i32 = arith.constant 0 : i32
    %c0_i32_0 = arith.constant 0 : i32
    %c0_i32_1 = arith.constant 0 : i32
    return %c0_i32, %c0_i32_0 : i32, i32
  }
  func.func @transform_8(%arg0: i32) -> (i32, i32) {
    %c0_i32 = arith.constant 0 : i32
    %c0_i32_0 = arith.constant 0 : i32
    %c0_i32_1 = arith.constant 0 : i32
    return %c0_i32, %c0_i32_0 : i32, i32
  }
  func.func @transform_9(%arg0: i32) -> (i32, i32) {
    %c0_i32 = arith.constant 0 : i32
    %c0_i32_0 = arith.constant 0 : i32
    return %c0_i32, %arg0 : i32, i32
  }
}

</mosaic_0001>

<bundles_post_ra>
// kernel: tpu_custom_call.1
= control target key start
LH: loop header
LB: loop body
LE: loop exit
PB: predicated region body
PF: predicated region fallthrough
CT: control target
= control target key end

     0   :  { %vm125_vm0 = vcmask 1041408   ;;  %vm126_vm1 = vcmask 1042432   ;;  %v438_v2 = vmov 0   ;;  %v439_v5 = vmov 65535   ;;  %s570_s0 = inlined_call_operand.vmem [shape: f32[5,128], index: 0, kind: input, shape index: {}]   ;;  %s571_s1 = inlined_call_operand.vmem [shape: bf16[64,5], index: 1, kind: input, shape index: {}]   ;;  %s572_s2 = inlined_call_operand.vmem [shape: f32[64,1], index: 2, kind: input, shape index: {}]   ;;  %s573_s3 = inlined_call_operand.vmem [shape: bf16[32,64], index: 3, kind: input, shape index: {}]   ;;  %s574_s4 = inlined_call_operand.vmem [shape: f32[32,1], index: 4, kind: input, shape index: {}]   ;;  %s575_s5 = inlined_call_operand.vmem [shape: bf16[16,32], index: 5, kind: input, shape index: {}]   ;;  %s576_s6 = inlined_call_operand.vmem [shape: f32[16,1], index: 6, kind: input, shape index: {}]   ;;  %s577_s7 = inlined_call_operand.vmem [shape: bf16[4,16], index: 7, kind: input, shape index: {}]   ;;  %s578_s8 = inlined_call_operand.vmem [shape: f32[4,1], index: 8, kind: input, shape index: {}]   ;;  %s579_s9 = inlined_call_operand.hbm [shape: f32[4,128], index: 9, kind: output, shape index: {}]  }
   0x1   :  { %v50_v0 = vld [vmem:[%s572_s2 + $0x30] sm:$0xff]  ;;  %v34_v1 = vld [vmem:[%s570_s0] sm:$0x1f]  ;;  %405 = vset.pattern.permute.xlu0 %v438_v2  ;;  %406 = vset.pattern.permute.xlu1 %v438_v2  ;;  %v127_v6 = vsel %vm125_vm0, 4294967295, %v439_v5 }
   0x2   :  { %v35_v3 = vpack.c.bf16 %v34_v1, %v34_v1  ;;  %v48_v4 = vld [vmem:[%s572_s2 + $0x20] sm:$0xff]  ;;  %84 = vperm.xlu0 %405, %v50_v0   ;;  %v128_v7 = vsel %vm126_vm1, %v127_v6, 0  ;;  %407 = vset.pattern.permute.xlu2 %v438_v2 }
   0x3   :  { %74 = vperm.xlu1 %406, %v48_v4  }
   0x4   :  { %v130_v8 = vand.u32 %v128_v7, %v35_v3 }
   0x5   :  { %14 = vsyncpa [#allocation3], 0  ;;  %v394_v9 = vld [vmem:[%s571_s1] sm:$0xff]  ;;  %v397_v10 = vld [vmem:[%s571_s1 + $0x18] sm:$0xff]  ;;  %vm112_vm2 = vcmask 39936   ;;  %vm211_vm3 = vcmask 523264  }
   0x6   :  { %139 = vmatpush.bf16.msra.mxu0 %v130_v8  ;;  %401 = vmatpush.bf16.msra.mxu3 %v130_v8  ;;  %v51_v11 = vld [vmem:[%s572_s2 + $0x38] sm:$0xff]  ;;  %v49_v12 = vld [vmem:[%s572_s2 + $0x28] sm:$0xff]  ;;  %v46_v13 = vld [vmem:[%s572_s2 + $0x10] sm:$0xff]  ;;  %vm262_vm4 = vcmask 261120   ;;  %vm290_vm5 = vcmask 130048   ;;  %vm307_vm6 = vcmask 1043456  }
   0x7   :  { %64 = vperm.xlu2 %407, %v46_v13   ;;  %v44_v14 = vld [vmem:[%s572_s2] sm:$0xff]  ;;  %v45_v15 = vld [vmem:[%s572_s2 + $0x8] sm:$0xff]  ;;  %v47_v16 = vld [vmem:[%s572_s2 + $0x18] sm:$0xff]  ;;  %s349_s30 = sshll.u32 %s579_s9, 4  ;;  %s350_s30 = int_to_ptr.hbm [resolvable:$true] %s349_s30 }
   0x8   :  { %v395_v17 = vld [vmem:[%s571_s1 + $0x8] sm:$0xff]  ;;  %v180_v18 = vld [vmem:[%s574_s4 + $0x18] sm:$0xff]  ;;  %v177_v19 = vld [vmem:[%s574_s4] sm:$0xff] }
   0x9   :  { %374 = vmatmul.msk.bf16.vlgmr.msra.gmra.mxu0 %vm112_vm2, %v394_v9  ;;  %377 = vmatmul.msk.bf16.vlgmr.msra.gmra.mxu3 %vm112_vm2, %v397_v10  ;;  %v179_v20 = vld [vmem:[%s574_s4 + $0x10] sm:$0xff]  ;;  %v245_v21 = vld [vmem:[%s576_s6] sm:$0xff]  ;;  %v246_v22 = vld [vmem:[%s576_s6 + $0x8] sm:$0xff] }
   0xa   :  { %89 = vperm.xlu0 %405, %v51_v11   ;;  %v178_v23 = vld [vmem:[%s574_s4 + $0x8] sm:$0xff]  ;;  %v396_v24 = vld [vmem:[%s571_s1 + $0x10] sm:$0xff]  ;;  %v284_v25 = vld [vmem:[%s578_s8] sm:$0xf] }
   0xb   :  { %79 = vperm.xlu1 %406, %v49_v12   ;;  %v398_v62 = vld [vmem:[%s573_s3] sm:$0xff]  ;;  %v399_v63 = vld [vmem:[%s573_s3 + $0x8] sm:$0xff] }
   0xf   :  { %69 = vperm.xlu2 %407, %v47_v16  }
  0x12   :  { %54 = vperm.xlu0 %405, %v44_v14  }
  0x13   :  { %59 = vperm.xlu1 %406, %v45_v15  }
  0x17   :  { %193 = vperm.xlu2 %407, %v179_v20  }
  0x19   :  { %375 = vmatmul.msk.bf16.gmra.mxu0 %vm112_vm2, %v395_v17 }
  0x1a   :  { %198 = vperm.xlu0 %405, %v180_v18   ;;  %v400_v18 = vld [vmem:[%s575_s5] sm:$0xff]  ;;  %s440_s5 = smov [#allocation2]  }
  0x1b   :  { %183 = vperm.xlu1 %406, %v177_v19  }
  0x1f   :  { %188 = vperm.xlu2 %407, %v178_v23  }
  0x22   :  { %249 = vperm.xlu0 %405, %v245_v21  }
  0x23   :  { %254 = vperm.xlu1 %406, %v246_v22  }
  0x27   :  { %287 = vperm.xlu2 %407, %v284_v25  }
  0x29   :  { %376 = vmatmul.msk.bf16.gmra.mxu0 %vm112_vm2, %v396_v24 }
  0x61   :  { %v65_v40 = vpop.permute.xlu2 %64 }
  0x69   :  { %v70_v44 = vpop.permute.xlu2 %69 }
  0x71   :  { %v194_v2 = vpop.permute.xlu2 %193 }
  0x74   :  { %v85_v27 = vpop.permute.xlu0 %84 }
  0x75   :  { %v75_v38 = vpop.permute.xlu1 %74 }
  0x79   :  { %v189_v4 = vpop.permute.xlu2 %188 }
  0x7c   :  { %v90_v31 = vpop.permute.xlu0 %89 }
  0x7d   :  { %v80_v41 = vpop.permute.xlu1 %79 }
  0x84   :  { %v55_v52 = vpop.permute.xlu0 %54 }
  0x85   :  { %v60_v48 = vpop.permute.xlu1 %59 }
  0x86   :  { %v141_v26 = vpop.f32.mrf.mxu0 }
  0x87   :  { %v142_v56 = vadd.f32 %v141_v26, %v55_v52 }
  0x89   :  { %v161_v60 = vmax.f32 %v142_v56, 0.0 }
  0x8c   :  { %v156_v28 = vpop.f32.mrf.mxu3  ;;  %v199_v6 = vpop.permute.xlu0 %198 }
  0x8d   :  { %v157_v30 = vadd.f32 %v156_v28, %v85_v27  ;;  %v184_v10 = vpop.permute.xlu1 %183  ;;  %v282_v28 = vld [vmem:[%s577_s7] sm:$0x3]  ;;  %s347_s7 = sshll.u32 %s440_s5, 4  ;;  %s348_s7 = int_to_ptr.vmem [resolvable:$true] %s347_s7 }
  0x8e   :  { %v143_v29 = vpop.f32.mrf.mxu0 }
  0x8f   :  { %v167_v33 = vmax.f32 %v157_v30, 0.0  ;;  %v144_v53 = vadd.f32 %v143_v29, %v60_v48  ;;  %v288_v29 = vpop.permute.xlu2 %287 }
  0x91   :  { %v162_v58 = vmax.f32 %v144_v53, 0.0 }
  0x93   :  { %v173_v61 = vpack.c.bf16 %v162_v58, %v161_v60 }
  0x94   :  { %v158_v32 = vpop.f32.mrf.mxu3  ;;  %v250_v20 = vpop.permute.xlu0 %249 }
  0x95   :  { %v159_v34 = vadd.f32 %v158_v32, %v90_v31  ;;  %v255_v22 = vpop.permute.xlu1 %254 }
  0x96   :  { %v146_v35 = vpop.f32.mrf.mxu0 }
  0x97   :  { %v168_v36 = vmax.f32 %v159_v34, 0.0  ;;  %v147_v49 = vadd.f32 %v146_v35, %v65_v40 }
  0x99   :  { %v176_v37 = vpack.c.bf16 %v168_v36, %v167_v33  ;;  %v163_v57 = vmax.f32 %v147_v49, 0.0 }
  0x9b   :  { %222 = vmatpush.bf16.msra.mxu1 %v176_v37 }
  0x9e   :  { %v148_v39 = vpop.f32.mrf.mxu0 }
  0x9f   :  { %v149_v46 = vadd.f32 %v148_v39, %v70_v44 }
  0xa1   :  { %v164_v54 = vmax.f32 %v149_v46, 0.0 }
  0xa3   :  { %v174_v59 = vpack.c.bf16 %v164_v54, %v163_v57 }
  0xa6   :  { %v151_v42 = vpop.f32.mrf.mxu0 }
  0xa7   :  { %v152_v43 = vadd.f32 %v151_v42, %v75_v38 }
  0xa9   :  { %v165_v50 = vmax.f32 %v152_v43, 0.0 }
  0xae   :  { %v153_v45 = vpop.f32.mrf.mxu0 }
  0xaf   :  { %v154_v47 = vadd.f32 %v153_v45, %v80_v41 }
  0xb1   :  { %v166_v51 = vmax.f32 %v154_v47, 0.0 }
  0xb3   :  { %v175_v55 = vpack.c.bf16 %v166_v51, %v165_v50 }
  0xb5   :  { %223 = vmatpush.bf16.msra.mxu1 %v175_v55 }
  0xb9   :  { %224 = vmatpush.bf16.msra.mxu1 %v174_v59 }
  0xbd   :  { %225 = vmatpush.bf16.msra.mxu1 %v173_v61 }
  0xc0   :  { %386 = vmatmul.msk.bf16.vlgmr.msra.gmra.mxu1 %vm211_vm3, %v398_v62 }
  0xd0   :  { %387 = vmatmul.msk.bf16.gmra.mxu1 %vm211_vm3, %v399_v63 }
 0x13d   :  { %v227_v0 = vpop.f32.mrf.mxu1 }
 0x13e   :  { %v228_v11 = vadd.f32 %v227_v0, %v184_v10 }
 0x140   :  { %v237_v16 = vmax.f32 %v228_v11, 0.0 }
 0x145   :  { %v229_v1 = vpop.f32.mrf.mxu1 }
 0x146   :  { %v230_v8 = vadd.f32 %v229_v1, %v189_v4 }
 0x148   :  { %v238_v14 = vmax.f32 %v230_v8, 0.0 }
 0x14a   :  { %v243_v17 = vpack.c.bf16 %v238_v14, %v237_v16 }
 0x14d   :  { %v232_v3 = vpop.f32.mrf.mxu1 }
 0x14e   :  { %v233_v5 = vadd.f32 %v232_v3, %v194_v2 }
 0x150   :  { %v239_v12 = vmax.f32 %v233_v5, 0.0 }
 0x155   :  { %v234_v7 = vpop.f32.mrf.mxu1 }
 0x156   :  { %v235_v9 = vadd.f32 %v234_v7, %v199_v6 }
 0x158   :  { %v240_v13 = vmax.f32 %v235_v9, 0.0 }
 0x15a   :  { %v244_v15 = vpack.c.bf16 %v240_v13, %v239_v12 }
 0x15c   :  { %272 = vmatpush.bf16.msra.mxu2 %v244_v15 }
 0x160   :  { %273 = vmatpush.bf16.msra.mxu2 %v243_v17 }
 0x163   :  { %392 = vmatmul.msk.bf16.vlgmr.msra.gmra.mxu2 %vm262_vm4, %v400_v18 }
 0x1e6   :  { %v275_v19 = vpop.f32.mrf.mxu2 }
 0x1e7   :  { %v276_v21 = vadd.f32 %v275_v19, %v250_v20 }
 0x1e9   :  { %v280_v25 = vmax.f32 %v276_v21, 0.0 }
 0x1ee   :  { %v277_v23 = vpop.f32.mrf.mxu2 }
 0x1ef   :  { %v278_v24 = vadd.f32 %v277_v23, %v255_v22 }
 0x1f1   :  { %v281_v26 = vmax.f32 %v278_v24, 0.0 }
 0x1f3   :  { %v283_v27 = vpack.c.bf16 %v281_v26, %v280_v25 }
 0x1f5   :  { %301 = vmatpush.bf16.msrb.mxu3 %v283_v27 }
 0x1f8   :  { %393 = vmatmul.msk.bf16.vlgmr.msrb.gmra.mxu3 %vm290_vm5, %v282_v28 }
 0x27b   :  { %v303_v30 = vpop.f32.mrf.mxu3 }
 0x27c   :  { %v304_v31 = vadd.f32 %v303_v30, %v288_v29 }
 0x27e   :  { %v308_v32 = vsel %vm307_vm6, %v304_v31, -inf }
 0x27f   :  { %v309_v33 = vrot.slane %v308_v32, 4 }
 0x281   :  { %v310_v34 = vmax.f32 %v308_v32, %v309_v33 }
 0x283   :  { %v311_v35 = vrot.slane %v310_v34, 2  ;;  %v305_v36 = vpop.f32.mrf.mxu3 }
 0x285   :  { %v312_v37 = vmax.f32 %v310_v34, %v311_v35 }
 0x287   :  { %v313_v38 = vrot.slane %v312_v37, 1 }
 0x289   :  { %v314_v39 = vmax.f32 %v312_v37, %v313_v38 }
 0x28b   :  { %v315_v40 = vsub.f32 %v304_v31, %v314_v39 }
 0x28d   :  { %v316_v41 = vmul.f32 1.442695, %v315_v40 }
 0x28f   :  { %408 = vpow2.f32 %v316_v41 }
 0x295   :  { %v409_v42 = vpop.eup %408 }
 0x296   :  { %v318_v43 = vsel %vm307_vm6, %v409_v42, 0.0 }
 0x297   :  { %v319_v44 = vrot.slane %v318_v43, 4 }
 0x299   :  { %v320_v45 = vadd.f32 %v319_v44, %v318_v43 }
 0x29b   :  { %v321_v46 = vrot.slane %v320_v45, 2 }
 0x29d   :  { %v322_v47 = vadd.f32 %v321_v46, %v320_v45 }
 0x29f   :  { %v323_v48 = vrot.slane %v322_v47, 1 }
 0x2a1   :  { %v324_v49 = vadd.f32 %v323_v48, %v322_v47 }
 0x2a3   :  { %410 = vrcp.f32 %v324_v49  ;;  %v336_v53 = vand.u32 2147483648, %v324_v49  ;;  %v334_v55 = vand.u32 2147483647, %v324_v49  ;;  %vm330_vm8 = vweird.f32 %v324_v49 }
 0x2a5   :  { %v337_v57 = vor.u32 1.1754944e-38, %v336_v53  ;;  %vm335_vm10 = vcmp.eq.f32.partialorder %v334_v55, 8.507059e+37 }
 0x2a9   :  { %v411_v50 = vpop.eup %410 }
 0x2aa   :  { %v326_v51 = vmul.f32 %v411_v50, %v324_v49  ;;  %vm331_vm7 = vweird.f32 %v411_v50 }
 0x2ab   :  { %vm332_vm9 = vmor %vm330_vm8, %vm331_vm7 }
 0x2ac   :  { %v327_v52 = vsub.f32 1.0, %v326_v51 }
 0x2ae   :  { %v328_v54 = vmul.f32 %v411_v50, %v327_v52 }
 0x2b0   :  { %v329_v56 = vadd.f32 %v411_v50, %v328_v54 }
 0x2b2   :  { %v333_v58 = vsel %vm332_vm9, %v411_v50, %v329_v56 }
 0x2b3   :  { %v338_v59 = vsel %vm335_vm10, %v337_v57, %v333_v58 }
 0x2b4   :  { %v340_v60 = vmul.f32 %v409_v42, %v338_v59 }
 0x2b6   :  { %341 = vst [vmem:[#allocation2] sm:$0xf] %v340_v60 }
 0x2b7   :  { %352 = dma.vmem_to_hbm [thread:$0]  %s348_s7, 64, %s350_s30, [#allocation3]  }
 0x2b8   :  { %436 = dma.done.wait [#allocation3], 64  }
 0x2b9   :  { %437 = vsyncadd [#allocation3], 4294967232 }
 0x2ba   :  { %357 = vsyncpa [#allocation3], 1 }

</bundles_post_ra>
